<compile_context>
chip_gen: v7x
topology: tpu7x:2x2x1
jax: 0.10.0
libtpu: 0.0.40
codegen_flags: <defaults>
</compile_context>

<pallas_src>
import functools

import jax
import jax.numpy as jnp
import numpy as np
from jax.experimental import pallas as pl
from jax.experimental.pallas import tpu as pltpu


def _pbma_kernel(x_ref,
                 ws1_ref, bs1_ref, ws2_ref, bs2_ref,
                 wc1_ref, bc1_ref, wc2_ref, bc2_ref,
                 o_ref, *, n_per_batch):
    # x_ref block: (C, TB*N) — the lane axis is the flattened (batch, point)
    # index, so every 1x1 conv is a single W @ X matmul over the whole tile.
    x_raw = x_ref[...]
    x = x_raw.astype(jnp.float32)            # elementwise path stays f32
    xb = x_raw.astype(jnp.bfloat16)          # MXU input

    # Hoisted single reads of the resident weights / biases.
    ws1 = ws1_ref[...]; bs1 = bs1_ref[...]
    ws2 = ws2_ref[...]; bs2 = bs2_ref[...]
    wc1 = wc1_ref[...]; bc1 = bc1_ref[...]
    wc2 = wc2_ref[...]; bc2 = bc2_ref[...]

    # ---- spatial attention: Conv1d(k=1) -> ReLU -> Conv1d(k=1), max over C ----
    h = jnp.dot(ws1, xb, preferred_element_type=jnp.float32)              # (H, L)
    h = jnp.maximum(h + bs1, 0.0)
    s = jnp.dot(ws2, h.astype(jnp.bfloat16),
                preferred_element_type=jnp.float32) + bs2                 # (C, L)
    sa = jax.nn.sigmoid(jnp.max(s, axis=0, keepdims=True))                # (1, L)
    f1 = sa * x                                                           # (C, L)

    # ---- channel attention on the re-weighted feats ----
    h2 = jnp.dot(wc1, f1.astype(jnp.bfloat16),
                 preferred_element_type=jnp.float32)                      # (H, L)
    h2 = jnp.maximum(h2 + bc1, 0.0)
    c2 = jnp.dot(wc2, h2.astype(jnp.bfloat16),
                 preferred_element_type=jnp.float32) + bc2                # (C, L)

    # torch max_pool1d(kernel_size=N): per-batch max over the point axis, done
    # on static 128-aligned lane slices; single lane-dense store of the tile.
    tb = x.shape[-1] // n_per_batch
    if tb == 1:
        ca = jax.nn.sigmoid(jnp.max(c2, axis=-1, keepdims=True))          # (C, 1)
        o_ref[...] = (ca * f1).astype(o_ref.dtype)
    else:
        parts = []
        for i in range(tb):                       # static unroll, tb is small
            sl = slice(i * n_per_batch, (i + 1) * n_per_batch)
            ca = jax.nn.sigmoid(jnp.max(c2[:, sl], axis=-1, keepdims=True))
            parts.append(ca * f1[:, sl])
        o_ref[...] = jnp.concatenate(parts, axis=-1).astype(o_ref.dtype)


def _tpu_vmem_capacity_bytes(default=64 << 20):
    """Generation-aware VMEM capacity (falls back to the v7x per-TC minimum)."""
    try:
        return int(pltpu.get_tpu_info().vmem_capacity_bytes)
    except Exception:
        return default


def _choose_tb(B, C, N, itemsize, budget_bytes):
    """Batch elements per grid step: largest divisor of B whose feats tile fits
    the budget while keeping >= 2 grid steps when B allows (so both v7x
    TensorCores get work via the "parallel" grid axis)."""
    if N % 128 != 0:
        # Partial lane blocks would violate the (8,128) rule; take the whole
        # array in one step (block == full array shape is exempt).
        return B
    per_b = C * N * itemsize
    best = 1
    for tb in range(1, B + 1):
        if B % tb:
            continue
        if tb > 1 and tb * per_b > budget_bytes:
            continue
        if B >= 2 and B // tb < 2:
            continue
        best = tb
    return best


def pbma_forward(feats, params, tb=None):
    """feats: (B, C, N) float32/bfloat16, same layout as the torch module."""
    B, C, N = feats.shape
    itemsize = jnp.dtype(feats.dtype).itemsize
    vmem_cap = _tpu_vmem_capacity_bytes()
    tile_budget = max(1 << 20, min(8 << 20, vmem_cap // 32))  # ~2 MiB v7x, ~4 MiB v5e/v6e
    if tb is None:
        tb = _choose_tb(B, C, N, itemsize, tile_budget)
    assert B % tb == 0
    L = tb * N                               # lane width per grid step
    grid = (B // tb,)

    # One-time layout plumbing: (B, C, N) -> (C, B*N) so the kernel sees a
    # lane-dense slab and each conv layer is a single batched MXU matmul.
    x2 = jnp.transpose(feats, (1, 0, 2)).reshape(C, B * N)

    def full(a):
        nd = a.ndim
        return pl.BlockSpec(a.shape, lambda b: (0,) * nd)

    # in+out double-buffered tiles + f32/bf16 intermediates + weights + headroom.
    tile_bytes = C * L * itemsize
    vmem_limit = int(min(vmem_cap // 2, max(8 << 20, 12 * tile_bytes + (4 << 20))))

    kernel = functools.partial(_pbma_kernel, n_per_batch=N)
    out2 = pl.pallas_call(
        kernel,
        out_shape=jax.ShapeDtypeStruct((C, B * N), feats.dtype),
        grid_spec=pltpu.PrefetchScalarGridSpec(
            num_scalar_prefetch=0,
            grid=grid,
            in_specs=[
                pl.BlockSpec((C, L), lambda b: (0, b)),          # feats slab
                full(params["ws1"]), full(params["bs1"]),        # spatial conv1 w, b
                full(params["ws2"]), full(params["bs2"]),        # spatial conv2 w, b
                full(params["wc1"]), full(params["bc1"]),        # channel conv1 w, b
                full(params["wc2"]), full(params["bc2"]),        # channel conv2 w, b
            ],
            out_specs=pl.BlockSpec((C, L), lambda b: (0, b)),
        ),
        compiler_params=pltpu.CompilerParams(
            dimension_semantics=("parallel",),
            vmem_limit_bytes=vmem_limit),
    )(x2,
      params["ws1"], params["bs1"], params["ws2"], params["bs2"],
      params["wc1"], params["bc1"], params["wc2"], params["bc2"])

    # TODO(synk): when B == 1 (or odd) on v7x, add a second parallel grid axis
    # tiling N with a running channel-attention max so both TensorCores work.
    return jnp.transpose(out2.reshape(C, B, N), (1, 0, 2))


def init_params(key, in_channels, reduction):
    """Deterministic synthetic init. Torch Conv1d weight (O, I, 1) is stored as
    (O, I) so the kernel computes W @ x directly. Weights are bf16 (MXU-native,
    halves DMA/VMEM); biases stay f32 for the VPU math."""
    H = in_channels // reduction
    ks = jax.random.split(key, 8)
    s_c = 1.0 / np.sqrt(in_channels)
    s_h = 1.0 / np.sqrt(H)
    u = lambda k, shape, s: jax.random.uniform(k, shape, jnp.float32, -s, s)
    return {
        "ws1": u(ks[0], (H, in_channels), s_c).astype(jnp.bfloat16),
        "bs1": u(ks[1], (H, 1), s_c),
        "ws2": u(ks[2], (in_channels, H), s_h).astype(jnp.bfloat16),
        "bs2": u(ks[3], (in_channels, 1), s_h),
        "wc1": u(ks[4], (H, in_channels), s_c).astype(jnp.bfloat16),
        "bc1": u(ks[5], (H, 1), s_c),
        "wc2": u(ks[6], (in_channels, H), s_h).astype(jnp.bfloat16),
        "bc2": u(ks[7], (in_channels, 1), s_h),
    }


def pbma_reference(feats, p):
    """Pure-JAX f32 reference mirroring the torch forward exactly."""
    w = lambda k: p[k].astype(jnp.float32)
    hp = "highest"
    f = feats.astype(jnp.float32)
    h = jnp.maximum(
        jnp.einsum("hc,bcn->bhn", w("ws1"), f, precision=hp) + p["bs1"][None], 0.0)
    s = jnp.einsum("ch,bhn->bcn", w("ws2"), h, precision=hp) + p["bs2"][None]
    sa = jax.nn.sigmoid(jnp.max(s, axis=1, keepdims=True))
    f1 = sa * f
    h2 = jnp.maximum(
        jnp.einsum("hc,bcn->bhn", w("wc1"), f1, precision=hp) + p["bc1"][None], 0.0)
    c = jnp.einsum("ch,bhn->bcn", w("wc2"), h2, precision=hp) + p["bc2"][None]
    ca = jax.nn.sigmoid(jnp.max(c, axis=2, keepdims=True))
    return ca * f1


if __name__ == "__main__":
    B, C, N = 2, 32, 128
    reduction = 4

    key = jax.random.PRNGKey(0)
    k_feat, k_par = jax.random.split(key)
    feats = jax.random.normal(k_feat, (B, C, N), jnp.float32)
    params = init_params(k_par, C, reduction)

    fwd = jax.jit(pbma_forward)
    out = jax.block_until_ready(fwd(feats, params))
    ref = pbma_reference(feats, params)

    assert out.shape == (B, C, N)
    # bf16 matmul inputs (f32 accumulation) vs pure-f32 reference -> loose tol.
    np.testing.assert_allclose(np.asarray(out), np.asarray(ref), rtol=2e-2, atol=2e-2)

    print("KERNEL_OK")
</pallas_src>

<mosaic_0001>
module attributes {stable_mosaic.version = 11 : i64} {
  func.func @_pbma_kernel(%arg0: i32, %arg1: memref<32x128xf32, #tpu.memory_space<vmem>>, %arg2: memref<8x32xbf16, #tpu.memory_space<vmem>>, %arg3: memref<8x1xf32, #tpu.memory_space<vmem>>, %arg4: memref<32x8xbf16, #tpu.memory_space<vmem>>, %arg5: memref<32x1xf32, #tpu.memory_space<vmem>>, %arg6: memref<8x32xbf16, #tpu.memory_space<vmem>>, %arg7: memref<8x1xf32, #tpu.memory_space<vmem>>, %arg8: memref<32x8xbf16, #tpu.memory_space<vmem>>, %arg9: memref<32x1xf32, #tpu.memory_space<vmem>>, %arg10: memref<32x128xf32, #tpu.memory_space<vmem>>) attributes {dimension_semantics = [#tpu.dimension_semantics<parallel>], iteration_bounds = array<i64: 2>, scalar_prefetch = 0 : i64, scratch_operands = 0 : i64, tpu.core_type = #tpu.core_type<tc>, window_params = [{transform_indices = @transform_0, window_bounds = array<i64: 32, 128>}, {pipeline_mode = #tpu.pipeline_mode<synchronous>, transform_indices = @transform_1, window_bounds = array<i64: 8, 32>}, {pipeline_mode = #tpu.pipeline_mode<synchronous>, transform_indices = @transform_2, window_bounds = array<i64: 8, 1>}, {pipeline_mode = #tpu.pipeline_mode<synchronous>, transform_indices = @transform_3, window_bounds = array<i64: 32, 8>}, {pipeline_mode = #tpu.pipeline_mode<synchronous>, transform_indices = @transform_4, window_bounds = array<i64: 32, 1>}, {pipeline_mode = #tpu.pipeline_mode<synchronous>, transform_indices = @transform_5, window_bounds = array<i64: 8, 32>}, {pipeline_mode = #tpu.pipeline_mode<synchronous>, transform_indices = @transform_6, window_bounds = array<i64: 8, 1>}, {pipeline_mode = #tpu.pipeline_mode<synchronous>, transform_indices = @transform_7, window_bounds = array<i64: 32, 8>}, {pipeline_mode = #tpu.pipeline_mode<synchronous>, transform_indices = @transform_8, window_bounds = array<i64: 32, 1>}, {transform_indices = @transform_9, window_bounds = array<i64: 32, 128>}]} {
    %c0 = arith.constant 0 : index
    %c0_0 = arith.constant 0 : index
    %0 = vector.load %arg1[%c0, %c0_0] : memref<32x128xf32, #tpu.memory_space<vmem>>, vector<32x128xf32>
    %1 = arith.truncf %0 : vector<32x128xf32> to vector<32x128xbf16>
    %c0_1 = arith.constant 0 : index
    %c0_2 = arith.constant 0 : index
    %2 = vector.load %arg2[%c0_1, %c0_2] : memref<8x32xbf16, #tpu.memory_space<vmem>>, vector<8x32xbf16>
    %c0_3 = arith.constant 0 : index
    %c0_4 = arith.constant 0 : index
    %3 = vector.load %arg3[%c0_3, %c0_4] : memref<8x1xf32, #tpu.memory_space<vmem>>, vector<8x1xf32>
    %c0_5 = arith.constant 0 : index
    %c0_6 = arith.constant 0 : index
    %4 = vector.load %arg4[%c0_5, %c0_6] : memref<32x8xbf16, #tpu.memory_space<vmem>>, vector<32x8xbf16>
    %c0_7 = arith.constant 0 : index
    %c0_8 = arith.constant 0 : index
    %5 = vector.load %arg5[%c0_7, %c0_8] : memref<32x1xf32, #tpu.memory_space<vmem>>, vector<32x1xf32>
    %c0_9 = arith.constant 0 : index
    %c0_10 = arith.constant 0 : index
    %6 = vector.load %arg6[%c0_9, %c0_10] : memref<8x32xbf16, #tpu.memory_space<vmem>>, vector<8x32xbf16>
    %c0_11 = arith.constant 0 : index
    %c0_12 = arith.constant 0 : index
    %7 = vector.load %arg7[%c0_11, %c0_12] : memref<8x1xf32, #tpu.memory_space<vmem>>, vector<8x1xf32>
    %c0_13 = arith.constant 0 : index
    %c0_14 = arith.constant 0 : index
    %8 = vector.load %arg8[%c0_13, %c0_14] : memref<32x8xbf16, #tpu.memory_space<vmem>>, vector<32x8xbf16>
    %c0_15 = arith.constant 0 : index
    %c0_16 = arith.constant 0 : index
    %9 = vector.load %arg9[%c0_15, %c0_16] : memref<32x1xf32, #tpu.memory_space<vmem>>, vector<32x1xf32>
    %cst = arith.constant dense<0.000000e+00> : vector<8x128xf32>
    %10 = tpu.matmul %2, %1, %cst {dimension_numbers = #tpu.dot_dimension_numbers<[1], [0], [0], [1], [0, 0, 1, 1], [], []>} : vector<8x32xbf16>, vector<32x128xbf16>, vector<8x128xf32> -> vector<8x128xf32>
    %11 = vector.broadcast %3 : vector<8x1xf32> to vector<8x128xf32>
    %12 = arith.addf %10, %11 : vector<8x128xf32>
    %cst_17 = arith.constant 0.000000e+00 : f32
    %13 = vector.broadcast %cst_17 : f32 to vector<8x128xf32>
    %14 = arith.maximumf %12, %13 : vector<8x128xf32>
    %15 = arith.truncf %14 : vector<8x128xf32> to vector<8x128xbf16>
    %cst_18 = arith.constant dense<0.000000e+00> : vector<32x128xf32>
    %16 = tpu.matmul %4, %15, %cst_18 {dimension_numbers = #tpu.dot_dimension_numbers<[1], [0], [0], [1], [0, 0, 1, 1], [], []>} : vector<32x8xbf16>, vector<8x128xbf16>, vector<32x128xf32> -> vector<32x128xf32>
    %17 = vector.broadcast %5 : vector<32x1xf32> to vector<32x128xf32>
    %18 = arith.addf %16, %17 : vector<32x128xf32>
    %cst_19 = arith.constant dense<0xFF800000> : vector<128xf32>
    %19 = vector.multi_reduction <maximumf>, %18, %cst_19 [0] : vector<32x128xf32> to vector<128xf32>
    %20 = vector.shape_cast %19 : vector<128xf32> to vector<1x128xf32>
    %21 = arith.negf %20 : vector<1x128xf32>
    %22 = math.exp %21 : vector<1x128xf32>
    %cst_20 = arith.constant 1.000000e+00 : f32
    %23 = vector.broadcast %cst_20 : f32 to vector<1x128xf32>
    %24 = arith.addf %23, %22 : vector<1x128xf32>
    %25 = arith.divf %23, %24 : vector<1x128xf32>
    %26 = vector.broadcast %25 : vector<1x128xf32> to vector<32x128xf32>
    %27 = arith.mulf %26, %0 : vector<32x128xf32>
    %28 = arith.truncf %27 : vector<32x128xf32> to vector<32x128xbf16>
    %cst_21 = arith.constant dense<0.000000e+00> : vector<8x128xf32>
    %29 = tpu.matmul %6, %28, %cst_21 {dimension_numbers = #tpu.dot_dimension_numbers<[1], [0], [0], [1], [0, 0, 1, 1], [], []>} : vector<8x32xbf16>, vector<32x128xbf16>, vector<8x128xf32> -> vector<8x128xf32>
    %30 = vector.broadcast %7 : vector<8x1xf32> to vector<8x128xf32>
    %31 = arith.addf %29, %30 : vector<8x128xf32>
    %cst_22 = arith.constant 0.000000e+00 : f32
    %32 = vector.broadcast %cst_22 : f32 to vector<8x128xf32>
    %33 = arith.maximumf %31, %32 : vector<8x128xf32>
    %34 = arith.truncf %33 : vector<8x128xf32> to vector<8x128xbf16>
    %cst_23 = arith.constant dense<0.000000e+00> : vector<32x128xf32>
    %35 = tpu.matmul %8, %34, %cst_23 {dimension_numbers = #tpu.dot_dimension_numbers<[1], [0], [0], [1], [0, 0, 1, 1], [], []>} : vector<32x8xbf16>, vector<8x128xbf16>, vector<32x128xf32> -> vector<32x128xf32>
    %36 = vector.broadcast %9 : vector<32x1xf32> to vector<32x128xf32>
    %37 = arith.addf %35, %36 : vector<32x128xf32>
    %cst_24 = arith.constant dense<0xFF800000> : vector<32xf32>
    %38 = vector.multi_reduction <maximumf>, %37, %cst_24 [1] : vector<32x128xf32> to vector<32xf32>
    %39 = vector.shape_cast %38 : vector<32xf32> to vector<32x1xf32>
    %40 = arith.negf %39 : vector<32x1xf32>
    %41 = math.exp %40 : vector<32x1xf32>
    %cst_25 = arith.constant 1.000000e+00 : f32
    %42 = vector.broadcast %cst_25 : f32 to vector<32x1xf32>
    %43 = arith.addf %42, %41 : vector<32x1xf32>
    %44 = arith.divf %42, %43 : vector<32x1xf32>
    %45 = vector.broadcast %44 : vector<32x1xf32> to vector<32x128xf32>
    %46 = arith.mulf %45, %27 : vector<32x128xf32>
    %c0_26 = arith.constant 0 : index
    %c0_27 = arith.constant 0 : index
    %47 = vector.load %arg10[%c0_26, %c0_27] : memref<32x128xf32, #tpu.memory_space<vmem>>, vector<32x128xf32>
    tpu.vector_store %arg10[%c0_26, %c0_27], %46 {strides = array<i32>} : memref<32x128xf32, #tpu.memory_space<vmem>>, vector<32x128xf32>,
    return
  }
  func.func @transform_0(%arg0: i32) -> (i32, i32) {
    %c0_i32 = arith.constant 0 : i32
    %c0_i32_0 = arith.constant 0 : i32
    return %c0_i32, %arg0 : i32, i32
  }
  func.func @transform_1(%arg0: i32) -> (i32, i32) {
    %c0_i32 = arith.constant 0 : i32
    %c0_i32_0 = arith.constant 0 : i32
    %c0_i32_1 = arith.constant 0 : i32
    return %c0_i32, %c0_i32_0 : i32, i32
  }
  func.func @transform_2(%arg0: i32) -> (i32, i32) {
    %c0_i32 = arith.constant 0 : i32
    %c0_i32_0 = arith.constant 0 : i32
    %c0_i32_1 = arith.constant 0 : i32
    return %c0_i32, %c0_i32_0 : i32, i32
  }
  func.func @transform_3(%arg0: i32) -> (i32, i32) {
    %c0_i32 = arith.constant 0 : i32
    %c0_i32_0 = arith.constant 0 : i32
    %c0_i32_1 = arith.constant 0 : i32
    return %c0_i32, %c0_i32_0 : i32, i32
  }
  func.func @transform_4(%arg0: i32) -> (i32, i32) {
    %c0_i32 = arith.constant 0 : i32
    %c0_i32_0 = arith.constant 0 : i32
    %c0_i32_1 = arith.constant 0 : i32
    return %c0_i32, %c0_i32_0 : i32, i32
  }
  func.func @transform_5(%arg0: i32) -> (i32, i32) {
    %c0_i32 = arith.constant 0 : i32
    %c0_i32_0 = arith.constant 0 : i32
    %c0_i32_1 = arith.constant 0 : i32
    return %c0_i32, %c0_i32_0 : i32, i32
  }
  func.func @transform_6(%arg0: i32) -> (i32, i32) {
    %c0_i32 = arith.constant 0 : i32
    %c0_i32_0 = arith.constant 0 : i32
    %c0_i32_1 = arith.constant 0 : i32
    return %c0_i32, %c0_i32_0 : i32, i32
  }
  func.func @transform_7(%arg0: i32) -> (i32, i32) {
    %c0_i32 = arith.constant 0 : i32
    %c0_i32_0 = arith.constant 0 : i32
    %c0_i32_1 = arith.constant 0 : i32
    return %c0_i32, %c0_i32_0 : i32, i32
  }
  func.func @transform_8(%arg0: i32) -> (i32, i32) {
    %c0_i32 = arith.constant 0 : i32
    %c0_i32_0 = arith.constant 0 : i32
    %c0_i32_1 = arith.constant 0 : i32
    return %c0_i32, %c0_i32_0 : i32, i32
  }
  func.func @transform_9(%arg0: i32) -> (i32, i32) {
    %c0_i32 = arith.constant 0 : i32
    %c0_i32_0 = arith.constant 0 : i32
    return %c0_i32, %arg0 : i32, i32
  }
}

</mosaic_0001>

<bundles_post_ra>
// kernel: pbma_forward.1
= control target key start
LH: loop header
LB: loop body
LE: loop exit
PB: predicated region body
PF: predicated region fallthrough
CT: control target
= control target key end

     0   :  { %s1049_s30 = smov 0   ;;  %s1051_s10 = smov 0   ;;  %s1211_s0 = inlined_call_operand.vmem [shape: f32[32,256], index: 0, kind: input, shape index: {}]   ;;  %s1212_s1 = inlined_call_operand.vmem [shape: bf16[8,32], index: 1, kind: input, shape index: {}]   ;;  %s1213_s2 = inlined_call_operand.vmem [shape: f32[8,1], index: 2, kind: input, shape index: {}]   ;;  %s1214_s3 = inlined_call_operand.vmem [shape: bf16[32,8], index: 3, kind: input, shape index: {}]   ;;  %s1215_s4 = inlined_call_operand.vmem [shape: f32[32,1], index: 4, kind: input, shape index: {}]   ;;  %s1216_s5 = inlined_call_operand.vmem [shape: bf16[8,32], index: 5, kind: input, shape index: {}]   ;;  %s1217_s6 = inlined_call_operand.vmem [shape: f32[8,1], index: 6, kind: input, shape index: {}]   ;;  %s1218_s7 = inlined_call_operand.vmem [shape: bf16[32,8], index: 7, kind: input, shape index: {}]   ;;  %s1219_s8 = inlined_call_operand.vmem [shape: f32[32,1], index: 8, kind: input, shape index: {}]   ;;  %s1220_s9 = inlined_call_operand.vmem [shape: f32[32,256], index: 9, kind: output, shape index: {}]  }
   0x1   :  { %s1053_s11 = smov 0  }
   0x2 LB: > { %s849_s12 = sadd.s32 4294967295, %s994_s11   ;;  %s1066_s13 = sadd.s32 1, %s994_s11   ;;  %s994_s11 = sphi %s1053_s11, %s1224_s11   ;;  %s990_s10 = sphi %s1051_s10, %s1223_s10   ;;  %s986_s30 = sphi %s1049_s30, %s1222_s30  }
   0x3   : > { %s23_s14 = ssub.s32 %s994_s11, %s1066_s13  ;;  %s26_s15 = sadd.s32 1, %s990_s10 }
   0x4   : > { %p24_p0 = scmp.eq.s32.totalorder %s23_s14, 0  ;;  %p33_p1 = scmp.ne.s32.totalorder %s990_s10, %s986_s30 }
   0x5   : > { %p34_p2 = scmp.eq.s32.totalorder %s994_s11, 0  ;;  %p231_p3 = scmp.eq.s32.totalorder %s849_s12, 1 }
   0x6   : > { %s1077_s16 = scalar_select %p24_p0, %s990_s10, %s26_s15  }
   0x7   : > { %p35_p4 = por %p34_p2, %p33_p1  ;;  %p1079_p5 = por %p231_p3, %p33_p1 }
   0x8   : > { %p852_p6 = scmp.ge.s32.totalorder %s994_s11, 2 }
   0xa   : > { %277 = sbr.rel (%p852_p6) target bundleno = 24 (0x18), region = 48 }
  0x11   : > { %280 = sbr.rel (!%p35_p4) target bundleno = 24 (0x18), region = 52  ;;  %s282_s18 = sand.u32 (%p35_p4), 1, %s990_s10  }
  0x12   : > { %s854_s19 = sshll.u32 (%p35_p4), %s994_s11, 3  ;;  %s853_s20 = sshll.u32 (%p35_p4), %s282_s18, 5 }
  0x13   : > { %s286_s23 = scalar_lea.vmem (%p35_p4), %s1211_s0, %s854_s19  ;;  %s284_s24 = scalar_lea.vmem (%p35_p4), [#allocation2], %s853_s20 }
  0x14   : > { %v320_v0 = vld [vmem:[%s286_s23] sm:$0xff] (%p35_p4)  ;;  %v322_v1 = vld [vmem:[%s286_s23 + $0x10] sm:$0xff] (%p35_p4) }
  0x15   : > { %v324_v2 = vld [vmem:[%s286_s23 + $0x20] sm:$0xff] (%p35_p4)  ;;  %321 = vst [vmem:[%s284_s24] sm:$0xff] (%p35_p4), %v320_v0  ;;  %323 = vst [vmem:[%s284_s24 + $0x8] sm:$0xff] (%p35_p4), %v322_v1  ;;  %v326_v3 = vld [vmem:[%s286_s23 + $0x30] sm:$0xff] (%p35_p4) }
  0x16   : > { %325 = vst [vmem:[%s284_s24 + $0x10] sm:$0xff] (%p35_p4), %v324_v2  ;;  %327 = vst [vmem:[%s284_s24 + $0x18] sm:$0xff] (%p35_p4), %v326_v3 }
  0x18 PF: > { %p855_p7 = scmp.ge.s32.totalorder %s994_s11, 1  ;;  %p332_p8 = scmp.lt.s32.totalorder %s994_s11, 3 }
  0x1a   : > { %p333_p9 = pnand %p855_p7, %p332_p8 }
  0x1b   : > { %s339_s25 = sand.u32 (!%p333_p9), 1, %s986_s30   ;;  %v996_v4 = vmov (!%p333_p9), 0.0   ;;  %vm997_vm0 = vmmov (!%p333_p9), 0   ;;  %v381_v5 = vld [vmem:[%s1213_s2] sm:$0xff] (!%p333_p9)  ;;  %v998_v6 = vmov (!%p333_p9), 0   ;;  %v389_v14 = vld [vmem:[%s1215_s4 + $0x18] sm:$0xff] (!%p333_p9) }
  0x1c   : > { %336 = sbr.rel (%p333_p9) target bundleno = 1156 (0x484), region = 90  ;;  %889 = vmatprep.subr.bf16.mxu0 (!%p333_p9), %v996_v4  ;;  %s1093_s26 = sshll.u32 (!%p333_p9), %s339_s25, 5  ;;  %893 = vmatprep.mubr.msk.bf16.mxu0 (!%p333_p9), %vm997_vm0, %v996_v4  ;;  %v386_v7 = vld [vmem:[%s1215_s4] sm:$0xff] (!%p333_p9)  ;;  %vm405_vm1 = vcmask (!%p333_p9), 261120   ;;  %v398_v17 = vld [vmem:[%s1219_s8 + $0x10] sm:$0xff] (!%p333_p9)  ;;  %vm481_vm2 = vcmask (!%p333_p9), 64512  }
  0x1d   : > { %946 = vset.pattern.permute.xlu0 (!%p333_p9), %v998_v6  ;;  %947 = vset.pattern.permute.xlu1 (!%p333_p9), %v998_v6  ;;  %s341_s30 = scalar_lea.vmem (!%p333_p9), [#allocation2], %s1093_s26  ;;  %v380_v15 = vld [vmem:[%s1212_s1] sm:$0xf] (!%p333_p9)  ;;  %v387_v19 = vld [vmem:[%s1215_s4 + $0x8] sm:$0xff] (!%p333_p9)  ;;  %v388_v20 = vld [vmem:[%s1215_s4 + $0x10] sm:$0xff] (!%p333_p9)  ;;  %vm488_vm3 = vcmask (!%p333_p9), 1043456  }
  0x1e   : > { %v1104_v8 = vld [vmem:[%s341_s30] sm:$0xff] (!%p333_p9)  ;;  %v1106_v9 = vld [vmem:[%s341_s30 + $0x8] sm:$0xff] (!%p333_p9)  ;;  %v1108_v10 = vld [vmem:[%s341_s30 + $0x10] sm:$0xff] (!%p333_p9)  ;;  %402 = vperm.xlu0 (!%p333_p9), %946, %v381_v5   ;;  %458 = vperm.xlu1 (!%p333_p9), %947, %v387_v19   ;;  %s372_s15 = scalar_lea.vmem (!%p333_p9), [#allocation3], %s1093_s26 }
  0x1f   : > { %v378_v11 = vpack.c.bf16 (!%p333_p9), %v1106_v9, %v1104_v8  ;;  %v1112_v12 = vld [vmem:[%s341_s30 + $0x18] sm:$0xff] (!%p333_p9)  ;;  %v396_v16 = vld [vmem:[%s1219_s8] sm:$0xff] (!%p333_p9)  ;;  %v397_v22 = vld [vmem:[%s1219_s8 + $0x8] sm:$0xff] (!%p333_p9) }
  0x20   : > { %v379_v13 = vpack.c.bf16 (!%p333_p9), %v1112_v12, %v1108_v10  ;;  %v948_v18 = vld [vmem:[%s1214_s3] sm:$0xff] (!%p333_p9)   ;;  %v399_v23 = vld [vmem:[%s1219_s8 + $0x18] sm:$0xff] (!%p333_p9)  ;;  %v949_v33 = vld [vmem:[%s1214_s3 + $0x8] sm:$0xff] (!%p333_p9)  }
  0x21   : > { %890 = vmatpush3.bf16.msra.mxu0 (!%p333_p9), %v378_v11  ;;  %899 = vmatprep.mubr.msk.bf16.mxu1 (!%p333_p9), %vm481_vm2, %v948_v18  ;;  %v391_v21 = vld [vmem:[%s1217_s6] sm:$0xff] (!%p333_p9) }
  0x22   : > { %891 = vmatprep.subr.bf16.mxu0 (!%p333_p9), %v996_v4  ;;  %453 = vperm.xlu0 (!%p333_p9), %946, %v386_v7   ;;  %v390_v1 = vld [vmem:[%s1216_s5] sm:$0xf] (!%p333_p9) }
  0x23   : > { %463 = vperm.xlu1 %947, %v388_v20   ;;  %v950_v2 = vld [vmem:[%s1218_s7] sm:$0xff]   ;;  %s874_s18 = sshll.u32 (%p1079_p5), %s849_s12, 3 }
  0x24   : > { %s748_s20 = scalar_lea.vmem (%p1079_p5), %s1220_s9, %s874_s18 }
  0x25   : > { %892 = vmatpush3.bf16.msra.mxu0 %v379_v13 }
  0x26   : > { %468 = vperm.xlu0 %946, %v389_v14  }
  0x27   : > { %564 = vperm.xlu1 %947, %v391_v21  }
  0x28   : > { %894 = vmatmul.mubr.msk.bf16.vlgmr.msra.gmra.mrb[0].mxu0 %vm405_vm1, %v380_v15 }
  0x29   : > { %913 = vmatprep.mubr.msk.bf16.mxu0 %vm481_vm2, %v950_v2 }
  0x2a   : > { %614 = vperm.xlu0 %946, %v396_v16  }
  0x2b   : > { %619 = vperm.xlu1 %947, %v397_v22  }
  0x2e   : > { %624 = vperm.xlu0 %946, %v398_v17  }
  0x2f   : > { %629 = vperm.xlu1 %947, %v399_v23  }
  0x9d   : > { %v403_v24 = vpop.permute.xlu0 %402  ;;  %v459_v35 = vpop.permute.xlu1 %458 }
  0xa1   : > { %v454_v34 = vpop.permute.xlu0 %453 }
  0xa2   : > { %v464_v39 = vpop.permute.xlu1 %463 }
  0xa5   : > { %v469_v37 = vpop.permute.xlu0 %468 }
  0xa6   : > { %v565_v3 = vpop.permute.xlu1 %564 }
  0xa9   : > { %v615_v13 = vpop.permute.xlu0 %614 }
  0xaa   : > { %v620_v18 = vpop.permute.xlu1 %619 }
  0xad   : > { %v625_v21 = vpop.permute.xlu0 %624 }
  0xae   : > { %v630_v23 = vpop.permute.xlu1 %629 }
  0xfb   : > { %v443_v25 = vpop.f32.mrb[0].mxu0 }
  0xfc   : > { %v444_v26 = vadd.f32 %v443_v25, %v403_v24  ;;  %v895_v27 = vpop.f32.mrb[1].mxu0 }
  0xfd   : > { %v446_v28 = vpop.f32.mrb[2].mxu0 }
  0xfe   : > { %v449_v29 = vmax.f32 %v444_v26, 0.0  ;;  %v896_v30 = vpop.f32.mrb[3].mxu0 }
 0x100   : > { %v450_v31 = vpack.c.bf16 %v449_v29, %v449_v29 }
 0x102   : > { %917 = vmatprep.subr.msk.bf16.mxu1 %vm488_vm3, %v450_v31  ;;  %v490_v32 = vsel %vm488_vm3, %v450_v31, 0 }
 0x103   : > { %898 = vmatpush3.bf16.msra.mxu1 %v490_v32 }
 0x104   : > { %903 = vmatprep.subr.bf16.mxu1 %v996_v4 }
 0x106   : > { %900 = vmatmul.mubr.msk.bf16.vlgmr.msra.gmra.mrb[0].mxu1 %vm481_vm2, %v949_v33 }
 0x107   : > { %907 = vmatprep.mubr.msk.bf16.mxu1 %vm997_vm0, %v996_v4 }
 0x1d9   : > { %v901_v36 = vpop.f32.mrb[0].mxu1 }
 0x1da   : > { %v526_v38 = vpop.f32.mrb[1].mxu1  ;;  %v535_v41 = vadd.f32 %v901_v36, %v464_v39 }
 0x1db   : > { %v902_v40 = vpop.f32.mrb[2].mxu1  ;;  %v527_v44 = vadd.f32 %v526_v38, %v454_v34 }
 0x1dc   : > { %v538_v42 = vadd.f32 %v902_v40, %v469_v37  ;;  %v529_v43 = vpop.f32.mrb[3].mxu1 }
 0x1dd   : > { %v530_v45 = vadd.f32 %v529_v43, %v459_v35 }
 0x1de   : > { %v542_v46 = vmax.f32 %v535_v41, %v538_v42 }
 0x1df   : > { %v541_v47 = vmax.f32 %v527_v44, %v530_v45 }
 0x1e1   : > { %v543_v48 = vmax.f32 %v541_v47, %v542_v46 }
 0x1e3   : > { %v544_v49 = vrot.slane %v543_v48, 4 }
 0x1e5   : > { %v545_v50 = vmax.f32 %v543_v48, %v544_v49 }
 0x1e7   : > { %v546_v51 = vrot.slane %v545_v50, 2 }
 0x1e9   : > { %v547_v52 = vmax.f32 %v545_v50, %v546_v51 }
 0x1eb   : > { %v548_v53 = vrot.slane %v547_v52, 1 }
 0x1ed   : > { %v549_v54 = vmax.f32 %v547_v52, %v548_v53 }
 0x1ef   : > { %v863_v55 = vmul.f32 -1.442695, %v549_v54 }
 0x1f1   : > { %952 = vpow2.f32 %v863_v55 }
 0x1fb   : > { %v953_v56 = vpop.eup %952 }
 0x1fc   : > { %v553_v57 = vadd.f32 1.0, %v953_v56 }
 0x1fe   : > { %954 = vrcp.f32 %v553_v57 }
 0x208   : > { %v955_v58 = vpop.eup %954 }
 0x209   : > { %v1159_v59 = vmul.f32 %v955_v58, %v1104_v8  ;;  %v1162_v60 = vmul.f32 %v955_v58, %v1106_v9  ;;  %v1167_v62 = vmul.f32 %v955_v58, %v1108_v10  ;;  %v1170_v63 = vmul.f32 %v955_v58, %v1112_v12  ;;  %v951_v12 = vld [vmem:[%s1218_s7 + $0x8] sm:$0xff]  }
 0x20b   : > { %v560_v61 = vpack.c.bf16 %v1162_v60, %v1159_v59  ;;  %v561_v0 = vpack.c.bf16 %v1170_v63, %v1167_v62 }
 0x20d   : > { %904 = vmatpush3.bf16.msra.mxu1 %v560_v61 }
 0x20e   : > { %905 = vmatprep.subr.bf16.mxu1 %v996_v4 }
 0x211   : > { %906 = vmatpush3.bf16.msra.mxu1 %v561_v0 }
 0x214   : > { %908 = vmatmul.mubr.msk.bf16.vlgmr.msra.gmra.mrb[4].mxu1 %vm405_vm1, %v390_v1 }
 0x2e7   : > { %v604_v5 = vpop.f32.mrb[4].mxu1 }
 0x2e8   : > { %v605_v6 = vadd.f32 %v604_v5, %v565_v3  ;;  %v909_v4 = vpop.f32.mrb[5].mxu1 }
 0x2e9   : > { %v607_v7 = vpop.f32.mrb[6].mxu1 }
 0x2ea   : > { %v610_v8 = vmax.f32 %v605_v6, 0.0  ;;  %v910_v9 = vpop.f32.mrb[7].mxu1 }
 0x2ec   : > { %v611_v10 = vpack.c.bf16 %v610_v8, %v610_v8 }
 0x2ee   : > { %918 = vmatprep.subr.msk.bf16.mxu0 %vm488_vm3, %v611_v10  ;;  %v649_v11 = vsel %vm488_vm3, %v611_v10, 0 }
 0x2ef   : > { %912 = vmatpush3.bf16.msra.mxu0 %v649_v11 }
 0x2f2   : > { %914 = vmatmul.mubr.msk.bf16.vlgmr.msra.gmra.mrb[4].mxu0 %vm481_vm2, %v951_v12 }
 0x3c5   : > { %v915_v14 = vpop.f32.mrb[4].mxu0 }
 0x3c6   : > { %v685_v15 = vpop.f32.mrb[5].mxu0  ;;  %v694_v22 = vadd.f32 %v915_v14, %v625_v21 }
 0x3c7   : > { %v686_v16 = vadd.f32 %v685_v15, %v615_v13  ;;  %v916_v17 = vpop.f32.mrb[6].mxu0 }
 0x3c8   : > { %v688_v19 = vpop.f32.mrb[7].mxu0  ;;  %v697_v24 = vadd.f32 %v916_v17, %v630_v23 }
 0x3c9   : > { %v689_v20 = vadd.f32 %v688_v19, %v620_v18  ;;  %700 = vmax.xlane.f32.xlu0 %v686_v16 }
 0x3cb   : > { %702 = vmax.xlane.f32.xlu1 %v689_v20 }
 0x3cd   : > { %704 = vmax.xlane.f32.xlu0 %v694_v22 }
 0x3d1   : > { %706 = vmax.xlane.f32.xlu0 %v697_v24 }
 0x456   : > { %v701_v25 = vpop.xlane.xlu0 %700 }
 0x457   : > { %v869_v26 = vmul.f32 -1.442695, %v701_v25 }
 0x458   : > { %v703_v27 = vpop.xlane.xlu1 %702 }
 0x459   : > { %956 = vpow2.f32 %v869_v26  ;;  %v870_v28 = vmul.f32 -1.442695, %v703_v27 }
 0x45a   : > { %v705_v29 = vpop.xlane.xlu0 %704 }
 0x45b   : > { %958 = vpow2.f32 %v870_v28  ;;  %v871_v30 = vmul.f32 -1.442695, %v705_v29 }
 0x45d   : > { %960 = vpow2.f32 %v871_v30 }
 0x45e   : > { %v707_v31 = vpop.xlane.xlu0 %706 }
 0x45f   : > { %v872_v32 = vmul.f32 -1.442695, %v707_v31 }
 0x461   : > { %962 = vpow2.f32 %v872_v32 }
 0x463   : > { %v957_v33 = vpop.eup %956 }
 0x464   : > { %v720_v34 = vadd.f32 1.0, %v957_v33 }
 0x465   : > { %v959_v35 = vpop.eup %958 }
 0x466   : > { %964 = vrcp.f32 %v720_v34  ;;  %v721_v36 = vadd.f32 1.0, %v959_v35 }
 0x467   : > { %v961_v37 = vpop.eup %960 }
 0x468   : > { %966 = vrcp.f32 %v721_v36  ;;  %v722_v38 = vadd.f32 1.0, %v961_v37 }
 0x46a   : > { %968 = vrcp.f32 %v722_v38 }
 0x46b   : > { %v963_v39 = vpop.eup %962 }
 0x46c   : > { %v723_v40 = vadd.f32 1.0, %v963_v39 }
 0x46e   : > { %970 = vrcp.f32 %v723_v40 }
 0x470   : > { %v965_v41 = vpop.eup %964 }
 0x471   : > { %v732_v42 = vmul.f32 %v965_v41, %v1159_v59 }
 0x472   : > { %v967_v43 = vpop.eup %966 }
 0x473   : > { %736 = vst [vmem:[%s372_s15] sm:$0xff] %v732_v42  ;;  %v733_v44 = vmul.f32 %v967_v43, %v1162_v60 }
 0x474   : > { %v969_v45 = vpop.eup %968 }
 0x475   : > { %737 = vst [vmem:[%s372_s15 + $0x8] sm:$0xff] %v733_v44  ;;  %v734_v46 = vmul.f32 %v969_v45, %v1167_v62  ;;  %746 = sbr.rel (!%p1079_p5) target bundleno = 1156 (0x484), region = 98 }
 0x477   : > { %738 = vst [vmem:[%s372_s15 + $0x10] sm:$0xff] %v734_v46 }
 0x478   : > { %v971_v47 = vpop.eup %970 }
 0x479   : > { %v735_v48 = vmul.f32 %v971_v47, %v1170_v63 }
 0x47a   : > { %v782_v49 = vld [vmem:[%s372_s15] sm:$0xff] (%p1079_p5) }
 0x47b   : > { %739 = vst [vmem:[%s372_s15 + $0x18] sm:$0xff] %v735_v48  ;;  %783 = vst [vmem:[%s748_s20] sm:$0xff] (%p1079_p5), %v782_v49 }
 0x47c   : > { %v784_v50 = vld [vmem:[%s372_s15 + $0x8] sm:$0xff] }
 0x47d   : > { %785 = vst [vmem:[%s748_s20 + $0x10] sm:$0xff] %v784_v50 }
 0x47e   : > { %v786_v51 = vld [vmem:[%s372_s15 + $0x10] sm:$0xff] }
 0x47f   : > { %787 = vst [vmem:[%s748_s20 + $0x20] sm:$0xff] %v786_v51 }
 0x482   : > { %v788_v52 = vld [vmem:[%s372_s15 + $0x18] sm:$0xff] }
 0x483   : > { %789 = vst [vmem:[%s748_s20 + $0x30] sm:$0xff] %v788_v52 }
 0x484 PF: > { %p16_p10 = scmp.ge.s32.totalorder %s1066_s13, 4   ;;  %s1222_s30 = smov %s990_s10 }
 0x485   : > { %s1223_s10 = smov %s1077_s16  ;;  %s1224_s11 = smov %s1066_s13 }
 0x486   :  { %18 = sbr.rel (!%p16_p10) target bundleno = 2 (0x2), region = 167 }

</bundles_post_ra>
